<compile_context>
chip_gen: v6e
topology: v6e:2x2x1
jax: 0.10.0
libtpu: 0.0.40
codegen_flags: <defaults>
</compile_context>

<pallas_src>
import functools

import jax
import jax.numpy as jnp
from jax.experimental import pallas as pl
from jax.experimental.pallas import tpu as pltpu


def se_kernel(x_ref, w1t_ref, b1_ref, w2t_ref, b2_ref, o_ref, *, inv_t):
    # x_ref: (Nb, C, Tp) block in the activation's NATIVE dtype (bf16 or f32).
    x = x_ref[...]
    xf = x.astype(jnp.float32)                 # in-register upcast (v5e-safe math)

    # --- Squeeze: per-channel mean over the REAL time extent.  Sum in f32 and
    #     scale by 1/T_real; zero-filled pad lanes (if T was padded) are exact.
    s = jnp.sum(xf, axis=-1) * inv_t           # (Nb, C), f32, lane-dense in C

    # --- Excite: two kernel_size=1 Conv1d == lane-dense batched matmuls (MXU).
    h = jnp.dot(s, w1t_ref[...], preferred_element_type=jnp.float32) + b1_ref[...]
    h = jnp.maximum(h, 0.0)                    # ReLU
    z = jnp.dot(h, w2t_ref[...], preferred_element_type=jnp.float32) + b2_ref[...]
    # Sigmoid via EUP exp + EUP approximate reciprocal (stays off the VPU divide).
    g = pl.reciprocal(1.0 + jnp.exp(-z), approx=True)   # (Nb, C), f32

    # --- Scale: broadcast the per-channel gate across the time (lane) axis.
    o_ref[...] = (xf * g[:, :, None]).astype(o_ref.dtype)


def _vmem_budget_bytes():
    cap = 64 * 1024 * 1024
    try:
        cap = int(getattr(pltpu.get_tpu_info(), "vmem_capacity_bytes", cap))
    except Exception:
        pass
    # ~75% of physical VMEM: ~48 MiB on v7x (64 MiB), ~96 MiB on v5e/v6e (128 MiB).
    return min(cap * 3 // 4, 96 * 1024 * 1024)


def se_forward(x, w1, b1, w2, b2):
    """SEModule forward.

    x : (N, C, T) activations (f32 or bf16; output keeps x.dtype).
    w1: (bottleneck, C) or (bottleneck, C, 1)  — Conv1d(C->bottleneck, k=1) weight.
    b1: (bottleneck,)                          — its bias.
    w2: (C, bottleneck) or (C, bottleneck, 1)  — Conv1d(bottleneck->C, k=1) weight.
    b2: (C,)                                   — its bias.
    """
    # Accept Conv1d k=1 weights either pre-squeezed (out, in) or raw (out, in, 1).
    if w1.ndim == 3:
        assert w1.shape[-1] == 1, w1.shape
        w1 = w1[..., 0]
    if w2.ndim == 3:
        assert w2.shape[-1] == 1, w2.shape
        w2 = w2[..., 0]

    n, c, t = x.shape
    bneck = w1.shape[0]
    assert w1.shape == (bneck, c), (w1.shape, (bneck, c))
    assert w2.shape == (c, bneck), (w2.shape, (c, bneck))
    assert b1.shape == (bneck,) and b2.shape == (c,), (b1.shape, b2.shape)

    # Pad T up to a lane multiple so output stores are unmasked / lane-dense.
    t_pad = pl.cdiv(t, 128) * 128
    x_in = x if t_pad == t else jnp.pad(x, ((0, 0), (0, 0), (0, t_pad - t)))

    # Small SE parameters in f32, pre-transposed so the excitation matmuls are
    # lane-dense: results are (Nb, bneck) / (Nb, C) rows, not 1-lane columns.
    w1t = jnp.asarray(w1, jnp.float32).T            # (C, bneck)
    w2t = jnp.asarray(w2, jnp.float32).T            # (bneck, C)
    b1r = jnp.asarray(b1, jnp.float32).reshape(1, bneck)
    b2r = jnp.asarray(b2, jnp.float32).reshape(1, c)

    # --- Per-generation block sizing (Nb batch elements per grid step). ---
    vmem_budget = int(_vmem_budget_bytes())
    itemsize = jnp.dtype(x.dtype).itemsize
    # Per batch element: double-buffered in+out blocks (native dtype) plus a
    # conservative allowance for the in-kernel f32 temporaries.
    per_elem = 4 * c * t_pad * itemsize + 3 * c * t_pad * 4
    overhead = 4 * (2 * bneck * c + bneck + c) + (1 << 20)   # params + slack
    max_nb = (vmem_budget - overhead) // per_elem
    if max_nb < 1:
        # TODO(synk): T-tiled two-pass fallback (sum pass + scale pass) for
        # slabs that exceed the VMEM budget (hit first on v7x's 64 MiB VMEM).
        raise NotImplementedError("single (C, T) slab exceeds the VMEM budget")
    if n > 1:
        # Keep >= 2 grid steps so both v7x TensorCores get work.
        max_nb = min(max_nb, pl.cdiv(n, 2))
    nb = 1
    for d in range(1, n + 1):                        # largest divisor of n <= max_nb
        if n % d == 0 and d <= max_nb:
            nb = d

    kernel = functools.partial(se_kernel, inv_t=float(1.0 / t))

    out = pl.pallas_call(
        kernel,
        out_shape=jax.ShapeDtypeStruct((n, c, t_pad), x.dtype),
        grid=(n // nb,),
        in_specs=[
            # Nb full (C, Tp) slabs per grid step, in the activation's dtype.
            pl.BlockSpec((nb, c, t_pad), lambda i: (i, 0, 0)),
            # Small SE weights / biases: full blocks, resident across the grid.
            pl.BlockSpec((c, bneck), lambda i: (0, 0)),
            pl.BlockSpec((1, bneck), lambda i: (0, 0)),
            pl.BlockSpec((bneck, c), lambda i: (0, 0)),
            pl.BlockSpec((1, c), lambda i: (0, 0)),
        ],
        out_specs=pl.BlockSpec((nb, c, t_pad), lambda i: (i, 0, 0)),
        compiler_params=pltpu.CompilerParams(
            # Batch blocks are independent -> shard across v7x's 2 TCs.
            dimension_semantics=("parallel",),
            vmem_limit_bytes=vmem_budget,
        ),
    )(x_in, w1t, b1r, w2t, b2r)

    return out if t_pad == t else out[:, :, :t]


def _reference(x, w1, b1, w2, b2):
    # Plain-JAX reference of the PyTorch forward (math done in f32).
    xf = x.astype(jnp.float32)
    s = jnp.mean(xf, axis=-1, keepdims=True)                               # (N, C, 1)
    h = jnp.maximum(jnp.einsum("oc,ncx->nox", w1, s) + b1[None, :, None], 0.0)
    g = jax.nn.sigmoid(jnp.einsum("co,nox->ncx", w2, h) + b2[None, :, None])
    return xf * g


if __name__ == "__main__":
    key = jax.random.PRNGKey(0)
    kx, k1, k2, k3, k4, ky = jax.random.split(key, 6)

    # Small shapes consistent with SEModule's (batch, channels, time) input.
    N, C, T, BNECK = 2, 16, 256, 32
    w1 = jax.random.normal(k1, (BNECK, C), dtype=jnp.float32) * 0.1
    b1 = jax.random.normal(k2, (BNECK,), dtype=jnp.float32) * 0.1
    w2 = jax.random.normal(k3, (C, BNECK), dtype=jnp.float32) * 0.1
    b2 = jax.random.normal(k4, (C,), dtype=jnp.float32) * 0.1

    # Tolerances are loosened slightly vs. exact math because the gate uses the
    # EUP approximate reciprocal (pl.reciprocal(approx=True)).

    # 1) f32 activations, lane-aligned T.
    x32 = jax.random.normal(kx, (N, C, T), dtype=jnp.float32)
    out32 = jax.block_until_ready(se_forward(x32, w1, b1, w2, b2))
    ref32 = _reference(x32, w1, b1, w2, b2)
    assert out32.shape == x32.shape and out32.dtype == x32.dtype
    assert jnp.allclose(out32, ref32, atol=3e-2, rtol=2e-2), float(
        jnp.max(jnp.abs(out32 - ref32)))

    # 2) bf16 activations end-to-end (native-dtype HBM traffic, f32 math in-register).
    xbf = x32.astype(jnp.bfloat16)
    outbf = jax.block_until_ready(se_forward(xbf, w1, b1, w2, b2))
    refbf = _reference(xbf, w1, b1, w2, b2)
    assert outbf.dtype == jnp.bfloat16
    assert jnp.allclose(outbf.astype(jnp.float32), refbf, atol=6e-2, rtol=3e-2), float(
        jnp.max(jnp.abs(outbf.astype(jnp.float32) - refbf)))

    # 3) Non-lane-multiple T (exercises wrapper padding) and odd batch.
    x3 = jax.random.normal(ky, (3, C, 200), dtype=jnp.float32)
    out3 = jax.block_until_ready(se_forward(x3, w1, b1, w2, b2))
    ref3 = _reference(x3, w1, b1, w2, b2)
    assert out3.shape == x3.shape
    assert jnp.allclose(out3, ref3, atol=3e-2, rtol=2e-2), float(
        jnp.max(jnp.abs(out3 - ref3)))

    print("KERNEL_OK")
</pallas_src>

<mosaic_0001>
module attributes {stable_mosaic.version = 11 : i64} {
  func.func @se_kernel(%arg0: i32, %arg1: memref<1x16x256xf32, #tpu.memory_space<vmem>>, %arg2: memref<16x32xf32, #tpu.memory_space<vmem>>, %arg3: memref<1x32xf32, #tpu.memory_space<vmem>>, %arg4: memref<32x16xf32, #tpu.memory_space<vmem>>, %arg5: memref<1x16xf32, #tpu.memory_space<vmem>>, %arg6: memref<1x16x256xf32, #tpu.memory_space<vmem>>) attributes {dimension_semantics = [#tpu.dimension_semantics<parallel>], iteration_bounds = array<i64: 2>, scalar_prefetch = 0 : i64, scratch_operands = 0 : i64, tpu.core_type = #tpu.core_type<tc>, window_params = [{transform_indices = @transform_0, window_bounds = array<i64: 1, 16, 256>}, {pipeline_mode = #tpu.pipeline_mode<synchronous>, transform_indices = @transform_1, window_bounds = array<i64: 16, 32>}, {pipeline_mode = #tpu.pipeline_mode<synchronous>, transform_indices = @transform_2, window_bounds = array<i64: 1, 32>}, {pipeline_mode = #tpu.pipeline_mode<synchronous>, transform_indices = @transform_3, window_bounds = array<i64: 32, 16>}, {pipeline_mode = #tpu.pipeline_mode<synchronous>, transform_indices = @transform_4, window_bounds = array<i64: 1, 16>}, {transform_indices = @transform_5, window_bounds = array<i64: 1, 16, 256>}]} {
    %c0 = arith.constant 0 : index
    %c0_0 = arith.constant 0 : index
    %c0_1 = arith.constant 0 : index
    %0 = vector.load %arg1[%c0, %c0_0, %c0_1] : memref<1x16x256xf32, #tpu.memory_space<vmem>>, vector<1x16x256xf32>
    %cst = arith.constant dense<0.000000e+00> : vector<1x16xf32>
    %1 = vector.multi_reduction <add>, %0, %cst [2] : vector<1x16x256xf32> to vector<1x16xf32>
    %cst_2 = arith.constant 3.906250e-03 : f32
    %2 = vector.broadcast %cst_2 : f32 to vector<1x16xf32>
    %3 = arith.mulf %1, %2 : vector<1x16xf32>
    %c0_3 = arith.constant 0 : index
    %c0_4 = arith.constant 0 : index
    %4 = vector.load %arg2[%c0_3, %c0_4] : memref<16x32xf32, #tpu.memory_space<vmem>>, vector<16x32xf32>
    %cst_5 = arith.constant dense<0.000000e+00> : vector<1x32xf32>
    %5 = tpu.matmul %3, %4, %cst_5 {dimension_numbers = #tpu.dot_dimension_numbers<[1], [0], [0], [1], [0, 0, 1, 1], [], []>} : vector<1x16xf32>, vector<16x32xf32>, vector<1x32xf32> -> vector<1x32xf32>
    %c0_6 = arith.constant 0 : index
    %c0_7 = arith.constant 0 : index
    %6 = vector.load %arg3[%c0_6, %c0_7] : memref<1x32xf32, #tpu.memory_space<vmem>>, vector<1x32xf32>
    %7 = arith.addf %5, %6 : vector<1x32xf32>
    %cst_8 = arith.constant 0.000000e+00 : f32
    %8 = vector.broadcast %cst_8 : f32 to vector<1x32xf32>
    %9 = arith.maximumf %7, %8 : vector<1x32xf32>
    %c0_9 = arith.constant 0 : index
    %c0_10 = arith.constant 0 : index
    %10 = vector.load %arg4[%c0_9, %c0_10] : memref<32x16xf32, #tpu.memory_space<vmem>>, vector<32x16xf32>
    %cst_11 = arith.constant dense<0.000000e+00> : vector<1x16xf32>
    %11 = tpu.matmul %9, %10, %cst_11 {dimension_numbers = #tpu.dot_dimension_numbers<[1], [0], [0], [1], [0, 0, 1, 1], [], []>} : vector<1x32xf32>, vector<32x16xf32>, vector<1x16xf32> -> vector<1x16xf32>
    %c0_12 = arith.constant 0 : index
    %c0_13 = arith.constant 0 : index
    %12 = vector.load %arg5[%c0_12, %c0_13] : memref<1x16xf32, #tpu.memory_space<vmem>>, vector<1x16xf32>
    %13 = arith.addf %11, %12 : vector<1x16xf32>
    %cst_14 = arith.constant 0.000000e+00 : f32
    %14 = vector.broadcast %cst_14 : f32 to vector<1x16xf32>
    %15 = arith.subf %14, %13 : vector<1x16xf32>
    %16 = math.exp %15 : vector<1x16xf32>
    %cst_15 = arith.constant 1.000000e+00 : f32
    %17 = vector.broadcast %cst_15 : f32 to vector<1x16xf32>
    %18 = arith.addf %17, %16 : vector<1x16xf32>
    %19 = tpu.reciprocal %18 {approx = true} : vector<1x16xf32> -> vector<1x16xf32>
    %20 = vector.shape_cast %19 : vector<1x16xf32> to vector<1x16x1xf32>
    %21 = vector.broadcast %20 : vector<1x16x1xf32> to vector<1x16x256xf32>
    %22 = arith.mulf %0, %21 : vector<1x16x256xf32>
    %c0_16 = arith.constant 0 : index
    %c0_17 = arith.constant 0 : index
    %c0_18 = arith.constant 0 : index
    %23 = vector.load %arg6[%c0_16, %c0_17, %c0_18] : memref<1x16x256xf32, #tpu.memory_space<vmem>>, vector<1x16x256xf32>
    tpu.vector_store %arg6[%c0_16, %c0_17, %c0_18], %22 {strides = array<i32>} : memref<1x16x256xf32, #tpu.memory_space<vmem>>, vector<1x16x256xf32>,
    return
  }
  func.func @transform_0(%arg0: i32) -> (i32, i32, i32) {
    %c0_i32 = arith.constant 0 : i32
    %c0_i32_0 = arith.constant 0 : i32
    %c0_i32_1 = arith.constant 0 : i32
    return %arg0, %c0_i32, %c0_i32_0 : i32, i32, i32
  }
  func.func @transform_1(%arg0: i32) -> (i32, i32) {
    %c0_i32 = arith.constant 0 : i32
    %c0_i32_0 = arith.constant 0 : i32
    %c0_i32_1 = arith.constant 0 : i32
    return %c0_i32, %c0_i32_0 : i32, i32
  }
  func.func @transform_2(%arg0: i32) -> (i32, i32) {
    %c0_i32 = arith.constant 0 : i32
    %c0_i32_0 = arith.constant 0 : i32
    %c0_i32_1 = arith.constant 0 : i32
    return %c0_i32, %c0_i32_0 : i32, i32
  }
  func.func @transform_3(%arg0: i32) -> (i32, i32) {
    %c0_i32 = arith.constant 0 : i32
    %c0_i32_0 = arith.constant 0 : i32
    %c0_i32_1 = arith.constant 0 : i32
    return %c0_i32, %c0_i32_0 : i32, i32
  }
  func.func @transform_4(%arg0: i32) -> (i32, i32) {
    %c0_i32 = arith.constant 0 : i32
    %c0_i32_0 = arith.constant 0 : i32
    %c0_i32_1 = arith.constant 0 : i32
    return %c0_i32, %c0_i32_0 : i32, i32
  }
  func.func @transform_5(%arg0: i32) -> (i32, i32, i32) {
    %c0_i32 = arith.constant 0 : i32
    %c0_i32_0 = arith.constant 0 : i32
    %c0_i32_1 = arith.constant 0 : i32
    return %arg0, %c0_i32, %c0_i32_0 : i32, i32, i32
  }
}

</mosaic_0001>

<bundles_post_ra>
// kernel: tpu_custom_call.1
= control target key start
LH: loop header
LB: loop body
LE: loop exit
PB: predicated region body
PF: predicated region fallthrough
CT: control target
= control target key end

     0   :  { %10 = vsyncpa [#allocation3], 0  ;;  %s967_s0 = inlined_call_operand.hbm [shape: f32[2,16,256], index: 0, kind: input, shape index: {}]   ;;  %s968_s1 = inlined_call_operand.vmem [shape: f32[16,32], index: 1, kind: input, shape index: {}]   ;;  %s969_s2 = inlined_call_operand.vmem [shape: f32[1,32], index: 2, kind: input, shape index: {}]   ;;  %s970_s3 = inlined_call_operand.vmem [shape: f32[32,16], index: 3, kind: input, shape index: {}]   ;;  %s971_s4 = inlined_call_operand.vmem [shape: f32[1,16], index: 4, kind: input, shape index: {}]   ;;  %s972_s5 = inlined_call_operand.hbm [shape: f32[2,16,256], index: 5, kind: output, shape index: {}]  }
   0x1   :  { %12 = vsyncpa [#allocation3 + $0x1], 0 }
   0x2   :  { %13 = vsyncpa [#allocation4], 0 }
   0x3   :  { %15 = vsyncpa [#allocation4 + $0x1], 0  ;;  %s769_s18 = smov 0   ;;  %s771_s19 = smov 0  }
   0x4   :  { %s773_s20 = smov 0   ;;  %s775_s21 = smov 0  }
   0x5 LB: > { %s790_s22 = sadd.s32 4294967295, %s729_s21   ;;  %s537_s23 = sadd.s32 4294967294, %s729_s21   ;;  %s729_s21 = sphi %s775_s21, %s987_s21   ;;  %s725_s20 = sphi %s773_s20, %s986_s20   ;;  %s721_s19 = sphi %s771_s19, %s985_s19   ;;  %s717_s18 = sphi %s769_s18, %s984_s18  }
   0x6   : > { %s794_s24 = sadd.s32 1, %s729_s21   ;;  %s28_s25 = sadd.s32 1, %s725_s20 }
   0x7   : > { %s25_s26 = ssub.s32 %s729_s21, %s794_s24  ;;  %p35_p0 = scmp.ne.s32.totalorder %s725_s20, %s721_s19 }
   0x8   : > { %p26_p1 = scmp.eq.s32.totalorder %s25_s26, 0  ;;  %p36_p2 = scmp.eq.s32.totalorder %s729_s21, 0 }
   0x9   : > { %p41_p3 = scmp.ne.s32.totalorder %s721_s19, %s717_s18  ;;  %p42_p4 = scmp.eq.s32.totalorder %s790_s22, 0 }
   0xa   : > { %s806_s27 = scalar_select %p26_p1, %s725_s20, %s28_s25  }
   0xb   : > { %p808_p5 = por %p36_p2, %p35_p0  ;;  %p812_p6 = por %p42_p4, %p41_p3 }
   0xc   : > { %p149_p7 = scmp.eq.s32.totalorder %s790_s22, 1  ;;  %p155_p8 = scmp.eq.s32.totalorder %s537_s23, 1 }
   0xd   : > { %s976_s29 = scalar_select %p812_p6, 1, 0 }
   0xe   : > { %p593_p10 = scmp.lt.s32.totalorder %s729_s21, 2  ;;  %p819_p11 = por %p149_p7, %p35_p0 }
   0xf   : > { %p823_p12 = por %p155_p8, %p41_p3  ;;  %s187_s7 = sand.u32 1, %s725_s20  }
  0x10   : > { %s977_s30 = scalar_select %p819_p11, 1, 0 }
  0x11   : > { %s978_s6 = scalar_select %p823_p12, 1, 0 }
  0x12   : > { %s553_s8 = sshll.u32 %s729_s21, 9  ;;  %s540_s9 = sshll.u32 %s187_s7, 5 }
  0x13   : > { %s832_s12 = scalar_lea.hbm %s967_s0, %s553_s8  ;;  %s191_s13 = scalar_lea.vmem [#allocation2], %s540_s9 }
  0x14   : > { %s198_s14 = sshll.u32 %s191_s13, 4  ;;  %p836_p13 = pnand %p593_p10, %p808_p5  ;;  %s840_s14 = int_to_ptr.vmem [resolvable:$true] %s198_s14 }
  0x15   : > { %s842_s16 = scalar_lea.sflag [#allocation3], %s187_s7  ;;  %s637_s17 = scalar_lea.hbm %s832_s12, 512 }
  0x16   : > { %p638_p0 = scmp.ne.s32.totalorder %s832_s12, %s637_s17  ;;  %p639_p1 = pneg %p836_p13 }
  0x17   : > { %s642_s26 = scalar_lea.hbm %s967_s0, 1024  ;;  %p643_p4 = scmp.lt.s32.totalorder %s832_s12, %s967_s0 }
  0x18   : > { %p640_p2 = pnand %p639_p1, %p638_p0  ;;  %p644_p5 = scmp.lt.s32.totalorder %s642_s26, %s637_s17 }
  0x1a   : > { %p641_p3 = pneg %p640_p2  ;;  %p645_p7 = por %p644_p5, %p643_p4 }
  0x1c   : > { %p646_p8 = pnand %p645_p7, %p641_p3 }
  0x1e   : > { %649 = shalt.err (!%p646_p8)
}
  0x1f   : > { %s650_s7 = scalar_lea.vmem %s840_s14, 512  ;;  %s731_s9 = smov [#allocation2]  }
  0x20   : > { %p651_p10 = scmp.ne.s32.totalorder %s840_s14, %s650_s7  ;;  %s655_s10 = sshll.u32 %s731_s9, 4  ;;  %s656_s10 = int_to_ptr.vmem [resolvable:$false] %s655_s10 }
  0x21   : > { %s657_s11 = scalar_lea.vmem %s656_s10, 1024  ;;  %p658_p2 = scmp.lt.s32.totalorder %s840_s14, %s656_s10 }
  0x22   : > { %p653_p9 = pnand %p651_p10, %p639_p1  ;;  %p659_p12 = scmp.lt.s32.totalorder %s657_s11, %s650_s7 }
  0x24   : > { %p654_p0 = pneg %p653_p9  ;;  %p660_p11 = por %p659_p12, %p658_p2 }
  0x26   : > { %p661_p6 = pnand %p660_p11, %p654_p0 }
  0x28   : > { %664 = shalt.err (!%p661_p6)
}
  0x29   : > { %s732_s13 = smov 256   ;;  %s733_s17 = smov 16  }
  0x2a   : > { %588 = dma.hbm_to_vmem [thread:$0]  (!%p836_p13), %s832_s12, 512, %s840_s14, %s842_s16, %s732_s13, %s732_s13, %s733_s17  }
  0x2b   : > { %p543_p9 = scmp.ge.s32.totalorder %s729_s21, 1  ;;  %p206_p1 = scmp.lt.s32.totalorder %s729_s21, 3 }
  0x2d   : > { %p207_p3 = pnand %p543_p9, %p206_p1 }
  0x2e   : > { %s866_s23 = sand.u32 (!%p207_p3), 1, %s721_s19   ;;  %p980_p6 = scmp.ne.s32.totalorder (!%p207_p3), %s976_s29, 0 }
  0x2f   : > { %210 = sbr.rel (%p207_p3) target bundleno = 766 (0x2fe), region = 40  ;;  %s544_s25 = sshll.u32 (!%p207_p3), %s866_s23, 5 }
  0x30   : > { %s213_s26 = scalar_lea.sflag (!%p207_p3), [#allocation3], %s866_s23  ;;  %s216_s28 = scalar_lea.vmem (!%p207_p3), [#allocation2], %s544_s25 }
  0x34   : > { %708 = dma.done.wait (%p980_p6), %s213_s26, 512  }
  0x35   : > { %710 = vsyncadd (%p980_p6), %s213_s26, 4294966784  ;;  %v876_v0 = vld [vmem:[%s216_s28] sm:$0xff]  ;;  %v878_v1 = vld [vmem:[%s216_s28 + $0x8] sm:$0xff]  ;;  %v734_v6 = vmov 0.0   ;;  %vm735_vm0 = vmmov 0   ;;  %v260_v10 = vlaneseq  ;;  %vm271_vm1 = vcmask 130112  }
  0x36   : > { %v880_v2 = vld [vmem:[%s216_s28 + $0x10] sm:$0xff]  ;;  %v247_v3 = vadd.f32 %v878_v1, %v876_v0  ;;  %v884_v4 = vld [vmem:[%s216_s28 + $0x18] sm:$0xff]  ;;  %563 = vmatprep.subr.mxu0 %v734_v6  ;;  %v256_v7 = vld [vmem:[%s968_s1 + $0x8] sm:$0xff]  ;;  %570 = vmatprep.subr.mxu1 %v734_v6  ;;  %vm273_vm2 = vcmask 130048   ;;  %vm352_vm3 = vcmask 261120   ;;  %s242_s14 = scalar_lea.vmem [#allocation5], %s544_s25 }
  0x37   : > { %v250_v5 = vadd.f32 %v884_v4, %v880_v2  ;;  %564 = vmatpush3.msra.mxu0 %v256_v7  ;;  %v255_v8 = vld [vmem:[%s968_s1] sm:$0xff]  ;;  %567 = vmatprep.mubr.msk.f32.mxu0 %vm735_vm0, %v734_v6  ;;  %v350_v9 = vld [vmem:[%s970_s3 + $0x18] sm:$0xff]  ;;  %v261_v11 = vand.u32 127, %v260_v10  ;;  %v263_v12 = vshrl.u32 %v260_v10, 7  ;;  %v349_v23 = vld [vmem:[%s970_s3 + $0x10] sm:$0xff]  ;;  %s464_s15 = sshll.u32 %s242_s14, 4  ;;  %s917_s15 = int_to_ptr.vmem [resolvable:$true] %s464_s15 }
  0x38   : > { %248 = vadd.xlane.f32.xlu0 %v247_v3  ;;  %565 = vmatprep.subr.mxu0 %v734_v6  ;;  %v348_v24 = vld [vmem:[%s970_s3 + $0x8] sm:$0xff]  ;;  %v347_v25 = vld [vmem:[%s970_s3] sm:$0xff]  ;;  %s554_s16 = sshll.u32 %s790_s22, 9  ;;  %s451_s22 = scalar_lea.sflag [#allocation4], %s866_s23 }
  0x39   : > { %566 = vmatpush3.msra.mxu0 %v255_v8  ;;  %578 = vmatprep.mubr.msk.f32.mxu1 %vm735_vm0, %v734_v6  ;;  %v266_v13 = vadd.s32 4294967288, %v261_v11  ;;  %v264_v15 = vsub.s32 %v261_v11, %v263_v12  ;;  %v257_v26 = vld [vmem:[%s969_s2] sm:$0x1]  ;;  %v433_v39 = vsub.s32 0, %v263_v12  ;;  %s922_s25 = scalar_lea.hbm %s972_s5, %s554_s16  ;;  %s665_s9 = scalar_lea.vmem %s917_s15, 512 }
  0x3a   : > { %571 = vmatpush3.msra.mxu1 %v350_v9  ;;  %v351_v31 = vld [vmem:[%s971_s4] sm:$0x1]  ;;  %p666_p11 = scmp.ne.s32.totalorder %s917_s15, %s665_s9  ;;  %p981_p12 = scmp.ne.s32.totalorder %s977_s30, 0 }
  0x3b   : > { %572 = vmatprep.subr.mxu1 %v734_v6  ;;  %v269_v17 = vsub.s32 %v266_v13, %v263_v12  ;;  %s736_s10 = smov [#allocation5]  }
  0x3c   : > { %251 = vadd.xlane.f32.xlu0 %v250_v5  ;;  %573 = vmatpush3.msra.mxu1 %v349_v23  ;;  %p667_p13 = pnand %p666_p11, %p981_p12  ;;  %s669_s11 = sshll.u32 %s736_s10, 4  ;;  %s670_s11 = int_to_ptr.vmem [resolvable:$false] %s669_s11 }
  0x3d   : > { %574 = vmatprep.subr.mxu1 %v734_v6  ;;  %s671_s13 = scalar_lea.vmem %s670_s11, 1024  ;;  %p672_p5 = scmp.lt.s32.totalorder %s917_s15, %s670_s11 }
  0x3e   : > { %575 = vmatpush3.msra.mxu1 %v348_v24  ;;  %p668_p4 = pneg %p667_p13  ;;  %p673_p7 = scmp.lt.s32.totalorder %s671_s13, %s665_s9 }
  0x3f   : > { %576 = vmatprep.subr.mxu1 %v734_v6 }
  0x40   : > { %577 = vmatpush3.msra.mxu1 %v347_v25  ;;  %p674_p8 = por %p673_p7, %p672_p5 }
  0x42   : > { %p675_p10 = pnand %p674_p8, %p668_p4 }
  0xc1   : > { %v249_v14 = vpop.xlane.xlu0 %248 }
  0xc2   : > { %v253_v16 = vmul.f32 0.00390625, %v249_v14 }
  0xc4   : > { %v265_v20 = vrot.slane %v253_v16, %v264_v15 }
  0xc5   : > { %v252_v18 = vpop.xlane.xlu0 %251 }
  0xc6   : > { %v254_v19 = vmul.f32 0.00390625, %v252_v18 }
  0xc8   : > { %v270_v21 = vrot.slane %v254_v19, %v269_v17 }
  0xca   : > { %v272_v22 = vsel %vm271_vm1, %v270_v21, %v265_v20 }
  0xcb   : > { %568 = vmatmul.mubr.msk.f32.vlgmr.msra.gmra.mxu0 %vm273_vm2, %v272_v22 }
 0x18b   : > { %v342_v27 = vpop.f32.mrf.mxu0 }
 0x18c   : > { %v343_v28 = vadd.f32 %v342_v27, %v257_v26 }
 0x18d   : > { %v569_v29 = vpop.f32.mrf.mxu0 }
 0x18e   : > { %v346_v30 = vmax.f32 %v343_v28, 0.0 }
 0x190   : > { %579 = vmatmul.mubr.msk.f32.vlgmr.msra.gmra.mxu1 %vm352_vm3, %v346_v30 }
 0x250   : > { %v422_v32 = vpop.f32.mrf.mxu1 }
 0x251   : > { %v423_v33 = vadd.f32 %v422_v32, %v351_v31 }
 0x252   : > { %v580_v34 = vpop.f32.mrf.mxu1 }
 0x253   : > { %v426_v35 = vsub.f32 0.0, %v423_v33 }
 0x255   : > { %v427_v36 = vmul.f32 1.442695, %v426_v35 }
 0x257   : > { %633 = vpow2.f32 %v427_v36 }
 0x264   : > { %v634_v37 = vpop.eup %633 }
 0x265   : > { %v429_v38 = vadd.f32 1.0, %v634_v37 }
 0x267   : > { %635 = vrcp.f32 %v429_v38 }
 0x274   : > { %v636_v40 = vpop.eup %635 }
 0x275   : > { %v434_v41 = vrot.slane %v636_v40, %v433_v39 }
 0x277   : > { %436 = vbcast.lane.b32.xlu1 %v434_v41, 256 }
 0x27b   : > { %440 = vbcast.lane.b32.xlu1 %v434_v41, 264 }
 0x2e9   : > { %v437_v42 = vpop.permute.xlu1 %436 }
 0x2ea   : > { %v442_v43 = vmul.f32 %v437_v42, %v876_v0  ;;  %v443_v44 = vmul.f32 %v437_v42, %v878_v1 }
 0x2ec   : > { %446 = vst [vmem:[%s242_s14] sm:$0xff] %v442_v43  ;;  %447 = vst [vmem:[%s242_s14 + $0x8] sm:$0xff] %v443_v44 }
 0x2ed   : > { %v441_v45 = vpop.permute.xlu1 %440 }
 0x2ee   : > { %v444_v46 = vmul.f32 %v441_v45, %v880_v2  ;;  %v445_v47 = vmul.f32 %v441_v45, %v884_v4 }
 0x2f0   : > { %448 = vst [vmem:[%s242_s14 + $0x10] sm:$0xff] %v444_v46  ;;  %449 = vst [vmem:[%s242_s14 + $0x18] sm:$0xff] %v445_v47 }
 0x2f1   : > { %678 = shalt.err (!%p675_p10)
}
 0x2f2   : > { %s679_s17 = scalar_lea.hbm %s922_s25, 512  ;;  %s683_s29 = scalar_lea.hbm %s972_s5, 1024 }
 0x2f3   : > { %p680_p0 = scmp.ne.s32.totalorder %s922_s25, %s679_s17  ;;  %p684_p1 = scmp.lt.s32.totalorder %s922_s25, %s972_s5 }
 0x2f4   : > { %p685_p3 = scmp.lt.s32.totalorder %s683_s29, %s679_s17 }
 0x2f5   : > { %p681_p2 = pnand %p680_p0, %p981_p12 }
 0x2f6   : > { %p686_p6 = por %p685_p3, %p684_p1 }
 0x2f7   : > { %p682_p9 = pneg %p681_p2 }
 0x2f9   : > { %p687_p11 = pnand %p686_p6, %p682_p9 }
 0x2fb   : > { %690 = shalt.err (!%p687_p11)
}
 0x2fc   : > { %s737_s16 = smov 256   ;;  %s738_s8 = smov 16  }
 0x2fd   : > { %583 = dma.vmem_to_hbm [thread:$0]  (%p981_p12), %s917_s15, 512, %s922_s25, %s451_s22, %s737_s16, %s737_s16, %s738_s8  }
 0x2fe PF: > { %s479_s7 = sand.u32 1, %s717_s18   ;;  %p982_p13 = scmp.ne.s32.totalorder %s978_s6, 0 }
 0x2ff   : > { %p983_p4 = scmp.ge.s32.totalorder %s729_s21, 2  ;;  %s480_s9 = scalar_lea.sflag [#allocation4], %s479_s7 }
 0x301   : > { %p590_p5 = pnand %p983_p4, %p982_p13 }
 0x303   : > { %p591_p7 = pneg %p590_p5 }
 0x305   : > { %712 = dma.done.wait (%p591_p7), %s480_s9, 512  }
 0x306   : > { %714 = vsyncadd (%p591_p7), %s480_s9, 4294966784  ;;  %p18_p8 = scmp.ge.s32.totalorder %s794_s24, 4   ;;  %s984_s18 = smov %s721_s19 }
 0x307   : > { %s985_s19 = smov %s725_s20  ;;  %s986_s20 = smov %s806_s27 }
 0x308   : > { %s987_s21 = smov %s794_s24  ;;  %20 = sbr.rel (!%p18_p8) target bundleno = 5 (0x5), region = 85 }
 0x30d   :  { %485 = vsyncpa [#allocation3], 1 }
 0x30e   :  { %487 = vsyncpa [#allocation3 + $0x1], 1 }
 0x30f   :  { %488 = vsyncpa [#allocation4], 1 }
 0x310   :  { %490 = vsyncpa [#allocation4 + $0x1], 1 }

</bundles_post_ra>
